<compile_context>
chip_gen: v7x
topology: tpu7x:2x2x1
jax: 0.10.0
libtpu: 0.0.40
codegen_flags: <defaults>
</compile_context>

<pallas_src>
import functools

import jax
import jax.numpy as jnp
import numpy as np
from jax import lax
from jax.experimental import pallas as pl
from jax.experimental.pallas import tpu as pltpu

KERNEL_SIZE = 3
PADDING = 1


def _dsc_fused_kernel(x_ref, w_ref, b_ref, m_ref, o_ref, *, H, W, use_bf16_mxu):
    """Fused depthwise-3x3 + pointwise-1x1 conv; one batch element per grid step.

    x_ref : (1, C_in, H*W)     flattened NCHW input tile (spatial on lanes)
    w_ref : (C_out, K*K*C_in)  combined weights
    b_ref : (C_out, 1)         combined bias
    m_ref : (K*K, H*W)         0/1 border masks per tap
    o_ref : (1, C_out, H*W)    output tile (lane-dense store)
    """
    HW = H * W
    x = x_ref[0].astype(jnp.float32)          # (C_in, HW)
    masks = m_ref[...]                        # (K*K, HW)

    # Build the 9 shifted taps purely with lane-axis rotations + masks (no padded
    # scratch, no sublane-shifted slices, no reshapes).
    taps = []
    for kh in range(KERNEL_SIZE):
        for kw in range(KERNEL_SIZE):
            dh, dw = kh - PADDING, kw - PADDING
            shift = dh * W + dw               # static flat-index shift
            if shift == 0 and dh == 0 and dw == 0:
                taps.append(x)                # centre tap: no shift, mask is all-ones
            else:
                rolled = jnp.roll(x, -shift, axis=1)              # lane rotation
                t = kh * KERNEL_SIZE + kw
                m = masks[t:t + 1, :]                             # (1, HW)
                taps.append(rolled * m)
    patches = jnp.concatenate(taps, axis=0)   # (K*K*C_in, HW)

    w = w_ref[...].astype(jnp.float32)
    if use_bf16_mxu:                          # optional bf16 MXU path (v6e/v7x)
        patches = patches.astype(jnp.bfloat16)
        w = w.astype(jnp.bfloat16)

    # Single MXU matmul: (C_out, K*K*C_in) @ (K*K*C_in, HW) with f32 accumulation.
    y = jnp.dot(w, patches, preferred_element_type=jnp.float32)   # (C_out, HW)
    y = y + b_ref[...].astype(jnp.float32)                        # broadcast over lanes
    o_ref[0] = y.astype(o_ref.dtype)


def _border_masks(H, W):
    """masks[t, h*W+w] = 1 iff source pixel (h+dh, w+dw) of tap t lies inside the image."""
    masks = np.zeros((KERNEL_SIZE * KERNEL_SIZE, H * W), dtype=np.float32)
    hh = np.arange(H)
    ww = np.arange(W)
    for kh in range(KERNEL_SIZE):
        for kw in range(KERNEL_SIZE):
            dh, dw = kh - PADDING, kw - PADDING
            mh = ((hh + dh >= 0) & (hh + dh < H)).astype(np.float32)
            mw = ((ww + dw >= 0) & (ww + dw < W)).astype(np.float32)
            masks[kh * KERNEL_SIZE + kw] = np.outer(mh, mw).reshape(-1)
    return jnp.asarray(masks)


def depth_separable_conv_block(x_nchw, w_dw_oihw, b_dw, w_pw_oihw, b_pw,
                               *, use_bf16_mxu=False):
    """Forward pass equivalent to DepthSeparableConvBlock (default args).

    x_nchw    : (N, C_in, H, W)     float32
    w_dw_oihw : (C_in, 1, K, K)     depthwise conv weight (groups=C_in)
    b_dw      : (C_in,)
    w_pw_oihw : (C_out, C_in, 1, 1) pointwise conv weight
    b_pw      : (C_out,)
    returns   : (N, C_out, H, W)
    """
    N, C_in, H, W = x_nchw.shape
    C_out = w_pw_oihw.shape[0]
    HW = H * W

    # Fuse depthwise + pointwise weights/biases (no activation/BN between them).
    w_dw_k = w_dw_oihw[:, 0, :, :]                          # (C_in, K, K)
    w_pw_k = w_pw_oihw[:, :, 0, 0]                          # (C_out, C_in)
    # w_comb[o, kh, kw, c] = w_pw[o, c] * w_dw[c, kh, kw]
    w_comb = w_pw_k[:, None, None, :] * jnp.transpose(w_dw_k, (1, 2, 0))[None]
    w_comb = w_comb.reshape(C_out, KERNEL_SIZE * KERNEL_SIZE * C_in)
    b_comb = (w_pw_k @ b_dw + b_pw).reshape(C_out, 1)

    # Free contiguous reshape: keep NCHW, flatten spatial onto the lane axis.
    x_flat = x_nchw.reshape(N, C_in, HW)
    masks = _border_masks(H, W)

    kernel = functools.partial(_dsc_fused_kernel, H=H, W=W, use_bf16_mxu=use_bf16_mxu)

    out_flat = pl.pallas_call(
        kernel,
        out_shape=jax.ShapeDtypeStruct((N, C_out, HW), x_nchw.dtype),
        grid_spec=pltpu.PrefetchScalarGridSpec(
            num_scalar_prefetch=0,
            grid=(N,),
            in_specs=[
                pl.BlockSpec((1, C_in, HW), lambda n: (n, 0, 0)),
                pl.BlockSpec((C_out, KERNEL_SIZE * KERNEL_SIZE * C_in), lambda n: (0, 0)),
                pl.BlockSpec((C_out, 1), lambda n: (0, 0)),
                pl.BlockSpec((KERNEL_SIZE * KERNEL_SIZE, HW), lambda n: (0, 0)),
            ],
            out_specs=pl.BlockSpec((1, C_out, HW), lambda n: (n, 0, 0)),
        ),
        compiler_params=pltpu.CompilerParams(
            dimension_semantics=("parallel",)),
    )(x_flat, w_comb, b_comb, masks)

    # Free contiguous reshape back to PyTorch NCHW output convention.
    return out_flat.reshape(N, C_out, H, W)


def _reference(x_nchw, w_dw_oihw, b_dw, w_pw_oihw, b_pw):
    """Pure-JAX reference (lax.conv) mirroring the PyTorch module."""
    C_in = x_nchw.shape[1]
    y = lax.conv_general_dilated(
        x_nchw, w_dw_oihw, window_strides=(1, 1),
        padding=((PADDING, PADDING), (PADDING, PADDING)),
        dimension_numbers=("NCHW", "OIHW", "NCHW"),
        feature_group_count=C_in,
        precision=lax.Precision.HIGHEST)
    y = y + b_dw[None, :, None, None]
    z = lax.conv_general_dilated(
        y, w_pw_oihw, window_strides=(1, 1), padding="VALID",
        dimension_numbers=("NCHW", "OIHW", "NCHW"),
        precision=lax.Precision.HIGHEST)
    z = z + b_pw[None, :, None, None]
    return z


if __name__ == "__main__":
    key = jax.random.PRNGKey(0)
    k_x, k_wdw, k_bdw, k_wpw, k_bpw = jax.random.split(key, 5)

    N, C_in, H, W = 2, 4, 16, 16
    C_out = C_in  # out_channels=None -> in_channels

    x = jax.random.normal(k_x, (N, C_in, H, W), jnp.float32)
    w_dw = jax.random.normal(k_wdw, (C_in, 1, KERNEL_SIZE, KERNEL_SIZE), jnp.float32) * 0.1
    b_dw = jax.random.normal(k_bdw, (C_in,), jnp.float32) * 0.1
    w_pw = jax.random.normal(k_wpw, (C_out, C_in, 1, 1), jnp.float32) * 0.1
    b_pw = jax.random.normal(k_bpw, (C_out,), jnp.float32) * 0.1

    out = depth_separable_conv_block(x, w_dw, b_dw, w_pw, b_pw)
    out = jax.block_until_ready(out)

    ref = jax.block_until_ready(_reference(x, w_dw, b_dw, w_pw, b_pw))
    assert out.shape == (N, C_out, H, W)
    np.testing.assert_allclose(np.asarray(out), np.asarray(ref), rtol=1e-3, atol=1e-3)

    print("KERNEL_OK")
</pallas_src>

<mosaic_0001>
module attributes {stable_mosaic.version = 11 : i64} {
  func.func @_dsc_fused_kernel(%arg0: i32, %arg1: memref<1x4x256xf32, #tpu.memory_space<vmem>>, %arg2: memref<4x36xf32, #tpu.memory_space<vmem>>, %arg3: memref<4x1xf32, #tpu.memory_space<vmem>>, %arg4: memref<9x256xf32, #tpu.memory_space<vmem>>, %arg5: memref<1x4x256xf32, #tpu.memory_space<vmem>>) attributes {dimension_semantics = [#tpu.dimension_semantics<parallel>], iteration_bounds = array<i64: 2>, scalar_prefetch = 0 : i64, scratch_operands = 0 : i64, tpu.core_type = #tpu.core_type<tc>, window_params = [{transform_indices = @transform_0, window_bounds = array<i64: 1, 4, 256>}, {pipeline_mode = #tpu.pipeline_mode<synchronous>, transform_indices = @transform_1, window_bounds = array<i64: 4, 36>}, {pipeline_mode = #tpu.pipeline_mode<synchronous>, transform_indices = @transform_2, window_bounds = array<i64: 4, 1>}, {pipeline_mode = #tpu.pipeline_mode<synchronous>, transform_indices = @transform_3, window_bounds = array<i64: 9, 256>}, {transform_indices = @transform_4, window_bounds = array<i64: 1, 4, 256>}]} {
    %c0 = arith.constant 0 : index
    %c0_0 = arith.constant 0 : index
    %c0_1 = arith.constant 0 : index
    %0 = vector.load %arg1[%c0, %c0_0, %c0_1] : memref<1x4x256xf32, #tpu.memory_space<vmem>>, vector<1x4x256xf32>
    %1 = vector.shape_cast %0 : vector<1x4x256xf32> to vector<4x256xf32>
    %c0_2 = arith.constant 0 : index
    %c0_3 = arith.constant 0 : index
    %2 = vector.load %arg4[%c0_2, %c0_3] : memref<9x256xf32, #tpu.memory_space<vmem>>, vector<9x256xf32>
    %3 = vector.extract_strided_slice %1 {offsets = [0, 239], sizes = [4, 17], strides = [1, 1]} : vector<4x256xf32> to vector<4x17xf32>
    %4 = vector.extract_strided_slice %1 {offsets = [0, 0], sizes = [4, 239], strides = [1, 1]} : vector<4x256xf32> to vector<4x239xf32>
    %5 = tpu.concatenate %3, %4 in 1 : vector<4x17xf32>, vector<4x239xf32> -> vector<4x256xf32>
    %6 = vector.extract_strided_slice %2 {offsets = [0, 0], sizes = [1, 256], strides = [1, 1]} : vector<9x256xf32> to vector<1x256xf32>
    %7 = vector.broadcast %6 : vector<1x256xf32> to vector<4x256xf32>
    %8 = arith.mulf %5, %7 : vector<4x256xf32>
    %9 = vector.extract_strided_slice %1 {offsets = [0, 240], sizes = [4, 16], strides = [1, 1]} : vector<4x256xf32> to vector<4x16xf32>
    %10 = vector.extract_strided_slice %1 {offsets = [0, 0], sizes = [4, 240], strides = [1, 1]} : vector<4x256xf32> to vector<4x240xf32>
    %11 = tpu.concatenate %9, %10 in 1 : vector<4x16xf32>, vector<4x240xf32> -> vector<4x256xf32>
    %12 = vector.extract_strided_slice %2 {offsets = [1, 0], sizes = [1, 256], strides = [1, 1]} : vector<9x256xf32> to vector<1x256xf32>
    %13 = vector.broadcast %12 : vector<1x256xf32> to vector<4x256xf32>
    %14 = arith.mulf %11, %13 : vector<4x256xf32>
    %15 = vector.extract_strided_slice %1 {offsets = [0, 241], sizes = [4, 15], strides = [1, 1]} : vector<4x256xf32> to vector<4x15xf32>
    %16 = vector.extract_strided_slice %1 {offsets = [0, 0], sizes = [4, 241], strides = [1, 1]} : vector<4x256xf32> to vector<4x241xf32>
    %17 = tpu.concatenate %15, %16 in 1 : vector<4x15xf32>, vector<4x241xf32> -> vector<4x256xf32>
    %18 = vector.extract_strided_slice %2 {offsets = [2, 0], sizes = [1, 256], strides = [1, 1]} : vector<9x256xf32> to vector<1x256xf32>
    %19 = vector.broadcast %18 : vector<1x256xf32> to vector<4x256xf32>
    %20 = arith.mulf %17, %19 : vector<4x256xf32>
    %21 = vector.extract_strided_slice %1 {offsets = [0, 255], sizes = [4, 1], strides = [1, 1]} : vector<4x256xf32> to vector<4x1xf32>
    %22 = vector.extract_strided_slice %1 {offsets = [0, 0], sizes = [4, 255], strides = [1, 1]} : vector<4x256xf32> to vector<4x255xf32>
    %23 = tpu.concatenate %21, %22 in 1 : vector<4x1xf32>, vector<4x255xf32> -> vector<4x256xf32>
    %24 = vector.extract_strided_slice %2 {offsets = [3, 0], sizes = [1, 256], strides = [1, 1]} : vector<9x256xf32> to vector<1x256xf32>
    %25 = vector.broadcast %24 : vector<1x256xf32> to vector<4x256xf32>
    %26 = arith.mulf %23, %25 : vector<4x256xf32>
    %27 = vector.extract_strided_slice %1 {offsets = [0, 1], sizes = [4, 255], strides = [1, 1]} : vector<4x256xf32> to vector<4x255xf32>
    %28 = vector.extract_strided_slice %1 {offsets = [0, 0], sizes = [4, 1], strides = [1, 1]} : vector<4x256xf32> to vector<4x1xf32>
    %29 = tpu.concatenate %27, %28 in 1 : vector<4x255xf32>, vector<4x1xf32> -> vector<4x256xf32>
    %30 = vector.extract_strided_slice %2 {offsets = [5, 0], sizes = [1, 256], strides = [1, 1]} : vector<9x256xf32> to vector<1x256xf32>
    %31 = vector.broadcast %30 : vector<1x256xf32> to vector<4x256xf32>
    %32 = arith.mulf %29, %31 : vector<4x256xf32>
    %33 = vector.extract_strided_slice %1 {offsets = [0, 15], sizes = [4, 241], strides = [1, 1]} : vector<4x256xf32> to vector<4x241xf32>
    %34 = vector.extract_strided_slice %1 {offsets = [0, 0], sizes = [4, 15], strides = [1, 1]} : vector<4x256xf32> to vector<4x15xf32>
    %35 = tpu.concatenate %33, %34 in 1 : vector<4x241xf32>, vector<4x15xf32> -> vector<4x256xf32>
    %36 = vector.extract_strided_slice %2 {offsets = [6, 0], sizes = [1, 256], strides = [1, 1]} : vector<9x256xf32> to vector<1x256xf32>
    %37 = vector.broadcast %36 : vector<1x256xf32> to vector<4x256xf32>
    %38 = arith.mulf %35, %37 : vector<4x256xf32>
    %39 = vector.extract_strided_slice %1 {offsets = [0, 16], sizes = [4, 240], strides = [1, 1]} : vector<4x256xf32> to vector<4x240xf32>
    %40 = vector.extract_strided_slice %1 {offsets = [0, 0], sizes = [4, 16], strides = [1, 1]} : vector<4x256xf32> to vector<4x16xf32>
    %41 = tpu.concatenate %39, %40 in 1 : vector<4x240xf32>, vector<4x16xf32> -> vector<4x256xf32>
    %42 = vector.extract_strided_slice %2 {offsets = [7, 0], sizes = [1, 256], strides = [1, 1]} : vector<9x256xf32> to vector<1x256xf32>
    %43 = vector.broadcast %42 : vector<1x256xf32> to vector<4x256xf32>
    %44 = arith.mulf %41, %43 : vector<4x256xf32>
    %45 = vector.extract_strided_slice %1 {offsets = [0, 17], sizes = [4, 239], strides = [1, 1]} : vector<4x256xf32> to vector<4x239xf32>
    %46 = vector.extract_strided_slice %1 {offsets = [0, 0], sizes = [4, 17], strides = [1, 1]} : vector<4x256xf32> to vector<4x17xf32>
    %47 = tpu.concatenate %45, %46 in 1 : vector<4x239xf32>, vector<4x17xf32> -> vector<4x256xf32>
    %48 = vector.extract_strided_slice %2 {offsets = [8, 0], sizes = [1, 256], strides = [1, 1]} : vector<9x256xf32> to vector<1x256xf32>
    %49 = vector.broadcast %48 : vector<1x256xf32> to vector<4x256xf32>
    %50 = arith.mulf %47, %49 : vector<4x256xf32>
    %51 = tpu.concatenate %8, %14, %20, %26, %1, %32, %38, %44, %50 in 0 : vector<4x256xf32>, vector<4x256xf32>, vector<4x256xf32>, vector<4x256xf32>, vector<4x256xf32>, vector<4x256xf32>, vector<4x256xf32>, vector<4x256xf32>, vector<4x256xf32> -> vector<36x256xf32>
    %c0_4 = arith.constant 0 : index
    %c0_5 = arith.constant 0 : index
    %52 = vector.load %arg2[%c0_4, %c0_5] : memref<4x36xf32, #tpu.memory_space<vmem>>, vector<4x36xf32>
    %cst = arith.constant dense<0.000000e+00> : vector<4x256xf32>
    %53 = tpu.matmul %52, %51, %cst {dimension_numbers = #tpu.dot_dimension_numbers<[1], [0], [0], [1], [0, 0, 1, 1], [], []>} : vector<4x36xf32>, vector<36x256xf32>, vector<4x256xf32> -> vector<4x256xf32>
    %c0_6 = arith.constant 0 : index
    %c0_7 = arith.constant 0 : index
    %54 = vector.load %arg3[%c0_6, %c0_7] : memref<4x1xf32, #tpu.memory_space<vmem>>, vector<4x1xf32>
    %55 = vector.broadcast %54 : vector<4x1xf32> to vector<4x256xf32>
    %56 = arith.addf %53, %55 : vector<4x256xf32>
    %c0_8 = arith.constant 0 : index
    %c0_9 = arith.constant 0 : index
    %c0_10 = arith.constant 0 : index
    %57 = vector.load %arg5[%c0_8, %c0_9, %c0_10] : memref<1x4x256xf32, #tpu.memory_space<vmem>>, vector<1x4x256xf32>
    %58 = vector.shape_cast %57 : vector<1x4x256xf32> to vector<4x256xf32>
    %59 = vector.shape_cast %56 : vector<4x256xf32> to vector<1x4x256xf32>
    tpu.vector_store %arg5[%c0_8, %c0_9, %c0_10], %59 {strides = array<i32>} : memref<1x4x256xf32, #tpu.memory_space<vmem>>, vector<1x4x256xf32>,
    return
  }
  func.func @transform_0(%arg0: i32) -> (i32, i32, i32) {
    %c0_i32 = arith.constant 0 : i32
    %c0_i32_0 = arith.constant 0 : i32
    %c0_i32_1 = arith.constant 0 : i32
    return %arg0, %c0_i32, %c0_i32_0 : i32, i32, i32
  }
  func.func @transform_1(%arg0: i32) -> (i32, i32) {
    %c0_i32 = arith.constant 0 : i32
    %c0_i32_0 = arith.constant 0 : i32
    %c0_i32_1 = arith.constant 0 : i32
    return %c0_i32, %c0_i32_0 : i32, i32
  }
  func.func @transform_2(%arg0: i32) -> (i32, i32) {
    %c0_i32 = arith.constant 0 : i32
    %c0_i32_0 = arith.constant 0 : i32
    %c0_i32_1 = arith.constant 0 : i32
    return %c0_i32, %c0_i32_0 : i32, i32
  }
  func.func @transform_3(%arg0: i32) -> (i32, i32) {
    %c0_i32 = arith.constant 0 : i32
    %c0_i32_0 = arith.constant 0 : i32
    %c0_i32_1 = arith.constant 0 : i32
    return %c0_i32, %c0_i32_0 : i32, i32
  }
  func.func @transform_4(%arg0: i32) -> (i32, i32, i32) {
    %c0_i32 = arith.constant 0 : i32
    %c0_i32_0 = arith.constant 0 : i32
    %c0_i32_1 = arith.constant 0 : i32
    return %arg0, %c0_i32, %c0_i32_0 : i32, i32, i32
  }
}

</mosaic_0001>

<bundles_post_ra>
// kernel: tpu_custom_call.1
= control target key start
LH: loop header
LB: loop body
LE: loop exit
PB: predicated region body
PF: predicated region fallthrough
CT: control target
= control target key end

     0   :  { %9 = vsyncpa [#allocation3], 0  ;;  %s1161_s0 = inlined_call_operand.hbm [shape: f32[2,4,256], index: 0, kind: input, shape index: {}]   ;;  %s1162_s1 = inlined_call_operand.vmem [shape: f32[4,36], index: 1, kind: input, shape index: {}]   ;;  %s1163_s2 = inlined_call_operand.vmem [shape: f32[4,1], index: 2, kind: input, shape index: {}]   ;;  %s1164_s3 = inlined_call_operand.hbm [shape: f32[9,256], index: 3, kind: input, shape index: {}]   ;;  %s1165_s4 = inlined_call_operand.hbm [shape: f32[2,4,256], index: 4, kind: output, shape index: {}]  }
   0x1   :  { %11 = vsyncpa [#allocation3 + $0x1], 0 }
   0x2   :  { %12 = vsyncpa [#allocation6], 0 }
   0x3   :  { %13 = vsyncpa [#allocation4], 0 }
   0x4   :  { %15 = vsyncpa [#allocation4 + $0x1], 0  ;;  %s890_s15 = smov 0   ;;  %s892_s16 = smov 0  }
   0x5   :  { %s894_s17 = smov 0   ;;  %s896_s18 = smov 0  }
   0x6 LB: > { %s911_s19 = sadd.s32 4294967295, %s848_s18   ;;  %s618_s20 = sadd.s32 4294967294, %s848_s18   ;;  %s848_s18 = sphi %s896_s18, %s1185_s18   ;;  %s844_s17 = sphi %s894_s17, %s1184_s17   ;;  %s840_s16 = sphi %s892_s16, %s1183_s16   ;;  %s836_s15 = sphi %s890_s15, %s1182_s15  }
   0x7   : > { %p41_p0 = scmp.ne.s32.totalorder %s840_s16, %s836_s15  ;;  %p1166_p1 = scmp.eq.s32.totalorder %s911_s19, 0 }
   0x8   : > { %p134_p3 = scmp.eq.s32.totalorder %s618_s20, 1  ;;  %p619_p5 = scmp.ge.s32.totalorder %s848_s18, 1 }
   0x9   : > { %p920_p4 = por %p1166_p1, %p41_p0  ;;  %p141_p7 = scmp.lt.s32.totalorder %s848_s18, 3 }
   0xa   : > { %p925_p6 = por %p134_p3, %p41_p0  ;;  %s850_s24 = smov [#allocation5]  }
   0xb   : > { %s1169_s21 = scalar_select %p920_p4, 1, 0 }
   0xc   : > { %s1170_s22 = scalar_select %p925_p6, 1, 0 }
   0xd   : > { %p930_p8 = pnand %p619_p5, %p141_p7  ;;  %s159_s25 = sshll.u32 %s850_s24, 4  ;;  %s934_s25 = int_to_ptr.vmem [resolvable:$true] %s159_s25 }
   0xe   : > { %s946_s27 = sadd.s32 1, %s848_s18   ;;  %s28_s28 = sadd.s32 1, %s844_s17 }
   0xf   : > { %s1171_s23 = scalar_select %p930_p8, 1, 0 }
  0x10   : > { %p657_p9 = pneg %p930_p8  ;;  %s25_s29 = ssub.s32 %s848_s18, %s946_s27 }
  0x11   : > { %s720_s6 = scalar_lea.hbm %s1164_s3, 512 }
  0x12   : > { %p941_p11 = pnand %p657_p9, %p1166_p1  ;;  %p721_p12 = scmp.ne.s32.totalorder %s1164_s3, %s720_s6 }
  0x13   : > { %p727_p5 = scmp.lt.u32.totalorder %s720_s6, %s1164_s3 }
  0x14   : > { %p722_p13 = pneg %p941_p11 }
  0x16   : > { %p723_p0 = pnand %p722_p13, %p721_p12 }
  0x18   : > { %p724_p3 = pneg %p723_p0 }
  0x1a   : > { %p729_p7 = pnand %p727_p5, %p724_p3 }
  0x1c   : > { %732 = shalt.err (!%p729_p7)
}
  0x1d   : > { %s733_s11 = scalar_lea.vmem %s934_s25, 512  ;;  %p741_p2 = scmp.lt.s32.totalorder %s934_s25, %s934_s25 }
  0x1e   : > { %p734_p9 = scmp.ne.s32.totalorder %s934_s25, %s733_s11  ;;  %p742_p6 = scmp.lt.s32.totalorder %s733_s11, %s733_s11 }
  0x20   : > { %p736_p10 = pnand %p734_p9, %p722_p13  ;;  %p743_p4 = por %p742_p6, %p741_p2 }
  0x22   : > { %p737_p1 = pneg %p736_p10 }
  0x24   : > { %p744_p8 = pnand %p743_p4, %p737_p1 }
  0x26   : > { %747 = shalt.err (!%p744_p8)
}
  0x27   : > { %s851_s12 = smov 256   ;;  %s852_s13 = smov 16  }
  0x28   : > { %660 = dma.hbm_to_vmem [thread:$0]  (!%p941_p11), %s1164_s3, 512, %s934_s25, [#allocation6], %s851_s12, %s851_s12, %s852_s13  }
  0x29   : > { %p26_p2 = scmp.eq.s32.totalorder %s25_s29, 0  ;;  %p35_p1 = scmp.ne.s32.totalorder %s844_s17, %s840_s16 }
  0x2a   : > { %p36_p4 = scmp.eq.s32.totalorder %s848_s18, 0  ;;  %p670_p6 = scmp.lt.s32.totalorder %s848_s18, 2 }
  0x2b   : > { %s977_s24 = scalar_select %p26_p2, %s844_s17, %s28_s28  }
  0x2c   : > { %p37_p8 = por %p36_p4, %p35_p1  ;;  %p1173_p10 = scmp.eq.s32.totalorder %s911_s19, 1 }
  0x2d   : > { %s173_s5 = sand.u32 1, %s844_s17   ;;  %s639_s6 = sshll.u32 %s848_s18, 7 }
  0x2e   : > { %p981_p12 = por %p1173_p10, %p35_p1  ;;  %s622_s7 = sshll.u32 %s173_s5, 3 }
  0x2f   : > { %s990_s9 = scalar_lea.hbm %s1161_s0, %s639_s6  ;;  %s177_s25 = scalar_lea.vmem [#allocation2], %s622_s7 }
  0x30   : > { %s185_s28 = sshll.u32 %s177_s25, 4  ;;  %p992_p11 = pnand %p670_p6, %p37_p8  ;;  %s996_s28 = int_to_ptr.vmem [resolvable:$true] %s185_s28 }
  0x31   : > { %s174_s10 = scalar_lea.sflag [#allocation3], %s173_s5  ;;  %s748_s11 = scalar_lea.hbm %s990_s9, 128 }
  0x32   : > { %p749_p13 = scmp.ne.s32.totalorder %s990_s9, %s748_s11  ;;  %p750_p0 = pneg %p992_p11 }
  0x33   : > { %s753_s14 = scalar_lea.hbm %s1161_s0, 256  ;;  %p754_p7 = scmp.lt.u32.totalorder %s990_s9, %s1161_s0 }
  0x34   : > { %p751_p3 = pnand %p750_p0, %p749_p13  ;;  %p755_p9 = scmp.lt.u32.totalorder %s753_s14, %s748_s11 }
  0x35   : > { %p757_p1 = scmp.lt.u32.totalorder %s748_s11, %s990_s9 }
  0x36   : > { %p752_p5 = pneg %p751_p3  ;;  %p756_p2 = por %p755_p9, %p754_p7 }
  0x38   : > { %p758_p4 = por %p757_p1, %p756_p2 }
  0x3a   : > { %p759_p6 = pnand %p758_p4, %p752_p5 }
  0x3c   : > { %762 = shalt.err (!%p759_p6)
}
  0x3d   : > { %s763_s5 = scalar_lea.vmem %s996_s28, 128  ;;  %s853_s7 = smov [#allocation2]  }
  0x3e   : > { %p764_p8 = scmp.ne.s32.totalorder %s996_s28, %s763_s5  ;;  %s768_s26 = sshll.u32 %s853_s7, 4  ;;  %s769_s26 = int_to_ptr.vmem [resolvable:$false] %s768_s26 }
  0x3f   : > { %s770_s8 = scalar_lea.vmem %s769_s26, 256  ;;  %p771_p3 = scmp.lt.s32.totalorder %s996_s28, %s769_s26 }
  0x40   : > { %p766_p10 = pnand %p764_p8, %p750_p0  ;;  %p772_p7 = scmp.lt.s32.totalorder %s770_s8, %s763_s5 }
  0x42   : > { %p767_p13 = pneg %p766_p10  ;;  %p773_p9 = por %p772_p7, %p771_p3 }
  0x44   : > { %p774_p2 = pnand %p773_p9, %p767_p13 }
  0x46   : > { %777 = shalt.err (!%p774_p2)
}
  0x47   : > { %664 = dma.hbm_to_vmem [thread:$0]  (!%p992_p11), %s990_s9, 128, %s996_s28, %s174_s10  }
  0x48   : > { %p1176_p5 = scmp.ne.s32.totalorder %s1171_s23, 0 }
  0x49   : > { %s1026_s25 = sand.u32 (!%p1176_p5), 1, %s840_s16   ;;  %p1177_p0 = scmp.ne.s32.totalorder (!%p1176_p5), %s1169_s21, 0 }
  0x4a   : > { %194 = sbr.rel (%p1176_p5) target bundleno = 468 (0x1d4), region = 36  ;;  %s626_s11 = sshll.u32 (!%p1176_p5), %s1026_s25, 3 }
  0x4b   : > { %s197_s12 = scalar_lea.sflag (!%p1176_p5), [#allocation3], %s1026_s25  ;;  %s200_s13 = scalar_lea.vmem (!%p1176_p5), [#allocation2], %s626_s11 }
  0x51   : > { %823 = dma.done.wait (%p1177_p0), %s197_s12, 128  }
  0x52   : > { %825 = vsyncadd (%p1177_p0), %s197_s12, 4294967168  ;;  %p1178_p11 = scmp.eq.s32.totalorder %s911_s19, 0 }
  0x54   : > { %827 = dma.done.wait (%p1178_p11), [#allocation6], 512   ;;  %p1179_p1 = pmov %p1178_p11 }
  0x55   : > { %v1040_v0 = vld [vmem:[%s200_s13] sm:$0xff]  ;;  %s854_s23 = smov 1   ;;  %s855_s9 = smov 16   ;;  %v860_v2 = vmov 0.0   ;;  %v862_v3 = vmov 0   ;;  %v246_v5 = vlaneseq  ;;  %v1068_v10 = vld [vmem:[#allocation5] sm:$0xff] }
  0x56   : > { %829 = vsyncadd (%p1179_p1), [#allocation6], 4294966784  ;;  %299 = vrot.lane.b32.xlu1 %v1040_v0, %s854_s23  ;;  %259 = vrot.lane.b32.xlu0 %v1040_v0, %s855_s9  ;;  %v1046_v1 = vcombine.high %v1040_v0, %v1040_v0  ;;  %s856_s21 = smov 17   ;;  %s857_s28 = smov 15   ;;  %v431_v4 = vld [vmem:[%s1163_s2] sm:$0xf] }
  0x57   : > { %s858_s29 = smov 127   ;;  %s859_s10 = smov 112   ;;  %511 = vmatprep.mubr.f32.mxu0 %v860_v2  ;;  %718 = vset.pattern.permute.xlu0 %v862_v3  ;;  %v1065_v6 = vshrl.u32 %v246_v5, 7  ;;  %v1070_v11 = vld [vmem:[#allocation5 + $0x8] sm:$0xff]  ;;  %vm261_vm0 = vcmask 130048   ;;  %vm301_vm1 = vcmask 7168  }
  0x58   : > { %s861_s14 = smov 113   ;;  %s863_s20 = smov 111   ;;  %vm241_vm2 = vcmask 138240   ;;  %vm281_vm3 = vcmask 121856   ;;  %vm421_vm4 = vcmask 1043456   ;;  %vm320_vm5 = vcmask 1039360  }
  0x59   : > { %v268_v9 = vsub.s32 1, %v1065_v6  ;;  %v308_v12 = vsub.s32 3, %v1065_v6  ;;  %v248_v17 = vsub.s32 0, %v1065_v6  ;;  %v288_v22 = vsub.s32 2, %v1065_v6  ;;  %s640_s8 = sshll.u32 %s911_s19, 7  ;;  %s228_s12 = scalar_lea.vmem [#allocation7], %s626_s11 }
  0x5a   : > { %239 = vrot.lane.b32.xlu1 %v1040_v0, %s856_s21  ;;  %256 = vrot.lane.b32.xlu0 %v1046_v1, %s855_s9  ;;  %v328_v37 = vsub.s32 5, %v1065_v6  ;;  %v368_v42 = vsub.s32 7, %v1065_v6  ;;  %vm360_vm6 = vcmask 916480   ;;  %v348_v3 = vsub.s32 6, %v1065_v6  ;;  %s538_s13 = sshll.u32 %s228_s12, 4  ;;  %s864_s19 = smov [#allocation7]   ;;  %s1119_s13 = int_to_ptr.vmem [resolvable:$true] %s538_s13 }
  0x5b   : > { %v269_v14 = vrot.slane %v1068_v10, %v268_v9  ;;  %v273_v15 = vrot.slane %v1070_v11, %v268_v9  ;;  %v309_v20 = vrot.slane %v1068_v10, %v308_v12  ;;  %v313_v21 = vrot.slane %v1070_v11, %v308_v12  ;;  %s782_s11 = sshll.u32 %s864_s19, 4  ;;  %s783_s11 = int_to_ptr.vmem [resolvable:$false] %s782_s11 }
  0x5c   : > { %v249_v26 = vrot.slane %v1068_v10, %v248_v17  ;;  %v253_v27 = vrot.slane %v1070_v11, %v248_v17  ;;  %v289_v35 = vrot.slane %v1068_v10, %v288_v22  ;;  %v293_v36 = vrot.slane %v1070_v11, %v288_v22  ;;  %p785_p10 = scmp.lt.s32.totalorder %s1119_s13, %s783_s11 }
  0x5d   : > { %v329_v51 = vrot.slane %v1068_v10, %v328_v37  ;;  %v333_v52 = vrot.slane %v1070_v11, %v328_v37  ;;  %v369_v63 = vrot.slane %v1068_v10, %v368_v42  ;;  %v373_v2 = vrot.slane %v1070_v11, %v368_v42 }
  0x5e   : > { %296 = vrot.lane.b32.xlu1 %v1046_v1, %s854_s23  ;;  %236 = vrot.lane.b32.xlu0 %v1046_v1, %s856_s21  ;;  %vm340_vm7 = vcmask 924672   ;;  %vm380_vm8 = vcmask 908288   ;;  %vm437_vm9 = vcmask 293888   ;;  %s1117_s21 = scalar_lea.hbm %s1165_s4, %s640_s8 }
  0x62   : > { %279 = vrot.lane.b32.xlu1 %v1040_v0, %s857_s28  ;;  %276 = vrot.lane.b32.xlu0 %v1046_v1, %s857_s28  ;;  %s524_s28 = scalar_lea.sflag [#allocation4], %s1026_s25 }
  0x66   : > { %318 = vrot.lane.b32.xlu1 %v1046_v1, %s858_s29  ;;  %316 = vrot.lane.b32.xlu0 %v1040_v0, %s858_s29  ;;  %s778_s29 = scalar_lea.vmem %s1119_s13, 128 }
  0x67   : > { %p779_p4 = scmp.ne.s32.totalorder %s1119_s13, %s778_s29 }
  0x69   : > { %p780_p6 = pnand %p779_p4, %p981_p12 }
  0x6a   : > { %358 = vrot.lane.b32.xlu1 %v1046_v1, %s859_s10  ;;  %356 = vrot.lane.b32.xlu0 %v1040_v0, %s859_s10  ;;  %s784_s10 = scalar_lea.vmem %s783_s11, 256 }
  0x6b   : > { %p781_p8 = pneg %p780_p6  ;;  %p786_p13 = scmp.lt.s32.totalorder %s784_s10, %s778_s29 }
  0x6d   : > { %p787_p3 = por %p786_p13, %p785_p10 }
  0x6e   : > { %338 = vrot.lane.b32.xlu1 %v1046_v1, %s861_s14  ;;  %336 = vrot.lane.b32.xlu0 %v1040_v0, %s861_s14 }
  0x6f   : > { %p788_p7 = pnand %p787_p3, %p781_p8 }
  0x72   : > { %378 = vrot.lane.b32.xlu1 %v1046_v1, %s863_s20  ;;  %376 = vrot.lane.b32.xlu0 %v1040_v0, %s863_s20 }
  0x76   : > { %434 = vperm.xlu0 %718, %v431_v4  }
  0xc8   : > { %v300_v7 = vpop.permute.xlu1 %299  ;;  %v260_v8 = vpop.permute.xlu0 %259 }
  0xcc   : > { %v240_v13 = vpop.permute.xlu1 %239  ;;  %v257_v16 = vpop.permute.xlu0 %256 }
  0xcd   : > { %v262_v18 = vsel %vm261_vm0, %v260_v8, %v257_v16  ;;  %v265_v19 = vsel %vm261_vm0, %v257_v16, %v260_v8  ;;  %v353_v16 = vrot.slane %v1070_v11, %v348_v3 }
  0xce   : > { %v274_v23 = vmul.f32 %v269_v14, %v265_v19  ;;  %v275_v24 = vmul.f32 %v273_v15, %v262_v18  ;;  %v349_v15 = vrot.slane %v1068_v10, %v348_v3 }
  0xd0   : > { %v297_v25 = vpop.permute.xlu1 %296  ;;  %v237_v28 = vpop.permute.xlu0 %236  ;;  %v398_v43 = vrot.slane %v274_v23, 4  ;;  %v399_v44 = vrot.slane %v275_v24, 4 }
  0xd1   : > { %v302_v29 = vsel %vm301_vm1, %v300_v7, %v297_v25  ;;  %v305_v30 = vsel %vm301_vm1, %v297_v25, %v300_v7  ;;  %v242_v31 = vsel %vm241_vm2, %v240_v13, %v237_v28  ;;  %v245_v32 = vsel %vm241_vm2, %v237_v28, %v240_v13 }
  0xd2   : > { %v314_v33 = vmul.f32 %v309_v20, %v305_v30  ;;  %v315_v34 = vmul.f32 %v313_v21, %v302_v29  ;;  %v254_v38 = vmul.f32 %v249_v26, %v245_v32  ;;  %v255_v39 = vmul.f32 %v253_v27, %v242_v31  ;;  %v630_v26 = vld [vmem:[#allocation5 + $0x18] ss:$0 sm:$0xff]  ;;  %v629_v32 = vld [vmem:[#allocation5 + $0x10] ss:$0 sm:$0xff] }
  0xd4   : > { %v280_v40 = vpop.permute.xlu1 %279  ;;  %v277_v41 = vpop.permute.xlu0 %276  ;;  %v404_v47 = vrot.slane %v314_v33, 4  ;;  %v405_v48 = vrot.slane %v315_v34, 4  ;;  %v423_v55 = vsel %vm421_vm4, %v255_v39, %v399_v44  ;;  %v422_v57 = vsel %vm421_vm4, %v254_v38, %v398_v43 }
  0xd5   : > { %v282_v45 = vsel %vm281_vm3, %v280_v40, %v277_v41  ;;  %v285_v46 = vsel %vm281_vm3, %v277_v41, %v280_v40 }
  0xd6   : > { %v294_v49 = vmul.f32 %v289_v35, %v285_v46  ;;  %v295_v50 = vmul.f32 %v293_v36, %v282_v45 }
  0xd8   : > { %v319_v53 = vpop.permute.xlu1 %318  ;;  %v317_v54 = vpop.permute.xlu0 %316  ;;  %v425_v56 = vsel %vm421_vm4, %v295_v50, %v405_v48  ;;  %v424_v58 = vsel %vm421_vm4, %v294_v49, %v404_v47 }
  0xd9   : > { %v321_v59 = vsel %vm320_vm5, %v317_v54, %v319_v53  ;;  %v325_v60 = vsel %vm320_vm5, %v319_v53, %v317_v54  ;;  %v641_v61 = vpack.c.bf16 %v425_v56, %v423_v55  ;;  %v643_v62 = vpack.c.bf16 %v424_v58, %v422_v57 }
  0xda   : > { %v334_v4 = vmul.f32 %v329_v51, %v321_v59  ;;  %v335_v5 = vmul.f32 %v333_v52, %v325_v60 }
  0xdb   : > { %642 = vmatprep.subr.bf16.mxu0 %v641_v61 }
  0xdc   : > { %v359_v7 = vpop.permute.xlu1 %358  ;;  %644 = vmatpush1.bf16.msra.mxu0 %v643_v62  ;;  %v357_v8 = vpop.permute.xlu0 %356  ;;  %v411_v17 = vrot.slane %v334_v4, 4  ;;  %v412_v18 = vrot.slane %v335_v5, 4 }
  0xdd   : > { %v361_v9 = vsel %vm360_vm6, %v357_v8, %v359_v7  ;;  %v365_v12 = vsel %vm360_vm6, %v359_v7, %v357_v8 }
  0xde   : > { %v374_v13 = vmul.f32 %v369_v63, %v361_v9  ;;  %v375_v14 = vmul.f32 %v373_v2, %v365_v12  ;;  %v427_v28 = vsel %vm421_vm4, %v1046_v1, %v412_v18  ;;  %v426_v11 = vsel %vm421_vm4, %v1040_v0, %v411_v17  ;;  %v430_v1 = vld [vmem:[%s1162_s1] sm:$0xf] }
  0xe0   : > { %v339_v19 = vpop.permute.xlu1 %338  ;;  %v337_v20 = vpop.permute.xlu0 %336  ;;  %v417_v22 = vrot.slane %v374_v13, 4  ;;  %v418_v23 = vrot.slane %v375_v14, 4 }
  0xe1   : > { %v341_v6 = vsel %vm340_vm7, %v337_v20, %v339_v19  ;;  %v345_v21 = vsel %vm340_vm7, %v339_v19, %v337_v20 }
  0xe2   : > { %v354_v24 = vmul.f32 %v349_v15, %v341_v6  ;;  %v355_v25 = vmul.f32 %v353_v16, %v345_v21 }
  0xe4   : > { %v379_v27 = vpop.permute.xlu1 %378  ;;  %v429_v10 = vsel %vm421_vm4, %v355_v25, %v418_v23  ;;  %v377_v29 = vpop.permute.xlu0 %376  ;;  %v428_v30 = vsel %vm421_vm4, %v354_v24, %v417_v22 }
  0xe5   : > { %v645_v31 = vpack.c.bf16 %v429_v10, %v427_v28  ;;  %v381_v33 = vsel %vm380_vm8, %v377_v29, %v379_v27  ;;  %v385_v34 = vsel %vm380_vm8, %v379_v27, %v377_v29  ;;  %v647_v35 = vpack.c.bf16 %v428_v30, %v426_v11 }
  0xe6   : > { %v395_v36 = vmul.f32 %v630_v26, %v385_v34  ;;  %v394_v37 = vmul.f32 %v629_v32, %v381_v33 }
  0xe7   : > { %646 = vmatprep.subr.bf16.mxu0 %v645_v31 }
  0xe8   : > { %648 = vmatpush1.bf16.msra.mxu0 %v647_v35 }
  0xe9   : > { %631 = vmatprep.subr.msk.mxu0 %vm421_vm4, %v395_v36 }
  0xec   : > { %632 = vmatpush1.msk.msra.mxu0 %vm421_vm4, %v394_v37 }
  0xed   : > { %633 = vmatmul.mubr.msk.f32.vlgmr.msra.gmra.mrb[0].mxu0 %vm437_vm9, %v430_v1 }
  0xf5   : > { %v435_v0 = vpop.permute.xlu0 %434 }
 0x1c0   : > { %v513_v38 = vpop.f32.mrb[0].mxu0 }
 0x1c1   : > { %v514_v39 = vadd.f32 %v513_v38, %v435_v0  ;;  %v515_v40 = vpop.f32.mrb[1].mxu0 }
 0x1c2   : > { %v516_v41 = vadd.f32 %v515_v40, %v435_v0 }
 0x1c4   : > { %v520_v42 = vcombine.low %v514_v39, %v516_v41 }
 0x1c6   : > { %522 = vst [vmem:[%s228_s12] sm:$0xff] %v520_v42 }
 0x1c7   : > { %791 = shalt.err (!%p788_p7)
}
 0x1c8   : > { %s792_s25 = scalar_lea.hbm %s1117_s21, 128  ;;  %s796_s6 = scalar_lea.hbm %s1165_s4, 256 }
 0x1c9   : > { %p793_p9 = scmp.ne.s32.totalorder %s1117_s21, %s792_s25  ;;  %p797_p0 = scmp.lt.u32.totalorder %s1117_s21, %s1165_s4 }
 0x1ca   : > { %p798_p11 = scmp.lt.u32.totalorder %s796_s6, %s792_s25  ;;  %p800_p4 = scmp.lt.u32.totalorder %s792_s25, %s1117_s21 }
 0x1cb   : > { %p794_p2 = pnand %p793_p9, %p981_p12 }
 0x1cc   : > { %p799_p1 = por %p798_p11, %p797_p0 }
 0x1cd   : > { %p795_p5 = pneg %p794_p2 }
 0x1ce   : > { %p801_p6 = por %p800_p4, %p799_p1 }
 0x1d0   : > { %p802_p8 = pnand %p801_p6, %p795_p5 }
 0x1d2   : > { %805 = shalt.err (!%p802_p8)
}
 0x1d3   : > { %655 = dma.vmem_to_hbm [thread:$0]  (%p981_p12), %s1119_s13, 128, %s1117_s21, %s524_s28  }
 0x1d4 PF: > { %s550_s26 = sand.u32 1, %s836_s15   ;;  %p1180_p10 = scmp.ne.s32.totalorder %s1170_s22, 0 }
 0x1d5   : > { %p1181_p13 = scmp.ge.s32.totalorder %s848_s18, 2  ;;  %s551_s8 = scalar_lea.sflag [#allocation4], %s550_s26 }
 0x1d7   : > { %p666_p3 = pnand %p1181_p13, %p1180_p10 }
 0x1d9   : > { %831 = dma.done.wait (!%p666_p3), %s551_s8, 128  }
 0x1da   : > { %833 = vsyncadd (!%p666_p3), %s551_s8, 4294967168  ;;  %p18_p7 = scmp.ge.s32.totalorder %s946_s27, 4   ;;  %s1182_s15 = smov %s840_s16 }
 0x1db   : > { %s1183_s16 = smov %s844_s17  ;;  %s1184_s17 = smov %s977_s24 }
 0x1dc   : > { %s1185_s18 = smov %s946_s27  ;;  %20 = sbr.rel (!%p18_p7) target bundleno = 6 (0x6), region = 85 }
 0x1e3   :  { %556 = vsyncpa [#allocation3], 1 }
 0x1e4   :  { %558 = vsyncpa [#allocation3 + $0x1], 1 }
 0x1e5   :  { %559 = vsyncpa [#allocation6], 1 }
 0x1e6   :  { %560 = vsyncpa [#allocation4], 1 }
 0x1e7   :  { %562 = vsyncpa [#allocation4 + $0x1], 1 }

</bundles_post_ra>
